<compile_context>
chip_gen: v7x
topology: tpu7x:2x2x1
jax: 0.10.0
libtpu: 0.0.40
codegen_flags: <defaults>
</compile_context>

<pallas_src>
import jax
import jax.numpy as jnp
from jax import lax
from jax.experimental import pallas as pl
from jax.experimental.pallas import tpu as pltpu


def _resblock_kernel(x_ref, w1_ref, b1_ref, w2_ref, b2_ref, o_ref, col_ref):
    # x_ref/o_ref blocks: (Nb, H, WC); w*_ref: (3*WC, WC) bf16; b*_ref: (1, WC) f32
    # col_ref scratch: (Nb, H, 3*WC) f32 im2col slab.
    Nb, H, WC3 = col_ref.shape
    WC = WC3 // 3
    M = Nb * H

    # Re-zero only the per-image halo rows of the two shifted bands each step
    # (scratch persists across steps; not gated on program_id so it stays
    # correct when the "parallel" batch axis is sharded across TensorCores).
    zrow = jnp.zeros((Nb, 1, WC), jnp.float32)
    col_ref[:, 0:1, 0:WC] = zrow                      # x[h-1] band, row h=0
    col_ref[:, H - 1:H, 2 * WC:3 * WC] = zrow         # x[h+1] band, row h=H-1

    def conv(a_f32, w_ref):
        # im2col bands: x[h-1] | x[h] | x[h+1] (per-image H zero padding via the
        # halo rows above); kw taps + W zero padding are already folded into the
        # block-banded weights, so the whole 3x3 conv is ONE K=3*WC MXU matmul.
        col_ref[:, 1:H, 0:WC] = a_f32[:, 0:H - 1, :]
        col_ref[:, :, WC:2 * WC] = a_f32
        col_ref[:, 0:H - 1, 2 * WC:3 * WC] = a_f32[:, 1:H, :]
        lhs = col_ref[...].reshape(M, 3 * WC).astype(w_ref.dtype)   # bf16 lhs
        return jnp.dot(lhs, w_ref[...], preferred_element_type=jnp.float32)

    x = x_ref[...].astype(jnp.float32)                # (Nb, H, WC) — also identity

    # conv1 (+ bn1 scale folded into w1) + bias + relu — single f32 VPU pass
    y = jnp.maximum(conv(x, w1_ref) + b1_ref[...], 0.0)            # (M, WC)

    # conv2 (+ bn2 scale folded into w2) + bias + identity + relu
    out = conv(y.reshape(Nb, H, WC), w2_ref) + b2_ref[...] + x.reshape(M, WC)
    o_ref[...] = jnp.maximum(out, 0.0).reshape(Nb, H, WC)


def residual_block_pallas(x_nchw, params, eps=1e-5, block_n=8):
    """Forward pass of ResidualBlock (identity_downsample=None, stride=1)."""
    N, C, H, W = x_nchw.shape
    WC = W * C
    # Guard the lane-dense layout assumptions loudly (review concern).
    assert WC % 128 == 0, "lane-dense layout requires W*C to be a multiple of 128"
    assert params['conv1_w'].shape == (C, C, 3, 3) and params['conv2_w'].shape == (C, C, 3, 3)

    # NCHW -> NHWC -> (N, H, W*C): lane-dense last dim; ship activations as bf16.
    # TODO(synk): keep activations in NHWC/(N,H,W*C) end-to-end across the ResNet
    # so these wrapper transposes fuse away in the surrounding graph.
    x = jnp.transpose(x_nchw.astype(jnp.float32), (0, 2, 3, 1)).reshape(N, H, WC)
    x = x.astype(jnp.bfloat16)

    # Batch blocking: Nb images per grid step, stacked into the matmul M dim.
    Nb = min(block_n, N)
    Np = pl.cdiv(N, Nb) * Nb
    if Np != N:
        x = jnp.concatenate([x, jnp.zeros((Np - N, H, WC), x.dtype)], axis=0)

    def toeplitz(w_oihw):
        # torch (C_out, C_in, 3, 3) -> fused (3*WC, WC) block-banded matrix:
        # band kh rows map x[h-1+kh]; kw taps and W-direction zero padding are
        # folded in via the shifted-eye Kronecker products.
        wt = jnp.transpose(w_oihw, (2, 3, 1, 0)).astype(jnp.float32)   # (kh,kw,ci,co)
        mats = []
        for kh in range(3):
            t = jnp.zeros((WC, WC), jnp.float32)
            for kw in range(3):
                t = t + jnp.kron(jnp.eye(W, k=1 - kw, dtype=jnp.float32), wt[kh, kw])
            mats.append(t)
        return jnp.concatenate(mats, axis=0)                           # (3*WC, WC)

    def fold_bn(t, conv_b, gamma, beta, mean, var):
        # Fold eval-mode BN scale into the weight columns; keep only a bias vec.
        scale = gamma / jnp.sqrt(var + eps)                            # per out-channel
        bias = (conv_b - mean) * scale + beta
        scale_l = jnp.tile(scale, W)                                   # per-lane (WC,)
        bias_l = jnp.tile(bias, W).reshape(1, WC).astype(jnp.float32)
        w = (t * scale_l[None, :]).astype(jnp.bfloat16)                # bf16 MXU weights
        return w, bias_l

    w1, b1 = fold_bn(toeplitz(params['conv1_w']), params['conv1_b'],
                     params['bn1_g'], params['bn1_b'], params['bn1_m'], params['bn1_v'])
    w2, b2 = fold_bn(toeplitz(params['conv2_w']), params['conv2_b'],
                     params['bn2_g'], params['bn2_b'], params['bn2_m'], params['bn2_v'])

    out = pl.pallas_call(
        _resblock_kernel,
        out_shape=jax.ShapeDtypeStruct((Np, H, WC), jnp.float32),
        grid_spec=pltpu.PrefetchScalarGridSpec(
            num_scalar_prefetch=0,
            grid=(Np // Nb,),
            in_specs=[
                pl.BlockSpec((Nb, H, WC), lambda n: (n, 0, 0)),      # x (also identity)
                pl.BlockSpec((3 * WC, WC), lambda n: (0, 0)),        # fused conv1+bn1 weights
                pl.BlockSpec((1, WC), lambda n: (0, 0)),             # bias1
                pl.BlockSpec((3 * WC, WC), lambda n: (0, 0)),        # fused conv2+bn2 weights
                pl.BlockSpec((1, WC), lambda n: (0, 0)),             # bias2
            ],
            out_specs=pl.BlockSpec((Nb, H, WC), lambda n: (n, 0, 0)),
            scratch_shapes=[pltpu.VMEM((Nb, H, 3 * WC), jnp.float32)],
        ),
        compiler_params=pltpu.CompilerParams(dimension_semantics=("parallel",)),
    )(x, w1, b1, w2, b2)

    out = out[:N]
    # TODO(synk): for production ResNet channel counts (C >= 128) the banded
    # Toeplitz weights blow past v7x's 64 MiB VMEM and waste MXU FLOPs on
    # structural zeros — switch to direct per-channel matmuls with C on the lane
    # axis and tile H with a 1-row halo via index_map.
    return jnp.transpose(out.reshape(N, H, W, C), (0, 3, 1, 2))        # back to NCHW


def residual_block_ref(x_nchw, params, eps=1e-5):
    """Pure-JAX reference (eval-mode BatchNorm), for correctness checking."""
    def conv(x, w, b):
        y = lax.conv_general_dilated(
            x, w, window_strides=(1, 1), padding=((1, 1), (1, 1)),
            dimension_numbers=('NCHW', 'OIHW', 'NCHW'))
        return y + b[None, :, None, None]

    def bn(x, g, b, m, v):
        return (x - m[None, :, None, None]) / jnp.sqrt(v[None, :, None, None] + eps) \
               * g[None, :, None, None] + b[None, :, None, None]

    identity = x_nchw
    y = conv(x_nchw, params['conv1_w'], params['conv1_b'])
    y = jax.nn.relu(bn(y, params['bn1_g'], params['bn1_b'], params['bn1_m'], params['bn1_v']))
    y = conv(y, params['conv2_w'], params['conv2_b'])
    y = bn(y, params['bn2_g'], params['bn2_b'], params['bn2_m'], params['bn2_v'])
    return jax.nn.relu(y + identity)


if __name__ == "__main__":
    # Small shapes: batch=2, channels=8, spatial=16x16  (W*C = 128, lane-dense).
    N, C, H, W = 2, 8, 16, 16
    key = jax.random.PRNGKey(0)
    ks = jax.random.split(key, 13)

    params = {
        'conv1_w': 0.1 * jax.random.normal(ks[0], (C, C, 3, 3), jnp.float32),
        'conv1_b': 0.1 * jax.random.normal(ks[1], (C,), jnp.float32),
        'bn1_g':   1.0 + 0.1 * jax.random.normal(ks[2], (C,), jnp.float32),
        'bn1_b':   0.1 * jax.random.normal(ks[3], (C,), jnp.float32),
        'bn1_m':   0.1 * jax.random.normal(ks[4], (C,), jnp.float32),
        'bn1_v':   jnp.abs(1.0 + 0.1 * jax.random.normal(ks[5], (C,), jnp.float32)),
        'conv2_w': 0.1 * jax.random.normal(ks[6], (C, C, 3, 3), jnp.float32),
        'conv2_b': 0.1 * jax.random.normal(ks[7], (C,), jnp.float32),
        'bn2_g':   1.0 + 0.1 * jax.random.normal(ks[8], (C,), jnp.float32),
        'bn2_b':   0.1 * jax.random.normal(ks[9], (C,), jnp.float32),
        'bn2_m':   0.1 * jax.random.normal(ks[10], (C,), jnp.float32),
        'bn2_v':   jnp.abs(1.0 + 0.1 * jax.random.normal(ks[11], (C,), jnp.float32)),
    }

    x = jax.random.normal(ks[12], (N, C, H, W), jnp.float32)

    out = jax.block_until_ready(residual_block_pallas(x, params))
    ref = jax.block_until_ready(residual_block_ref(x, params))

    assert out.shape == (N, C, H, W)
    max_err = jnp.max(jnp.abs(out - ref))
    # bf16 MXU operands -> tolerance loosened accordingly (f32 epilogue).
    assert jnp.allclose(out, ref, atol=5e-2, rtol=5e-2), f"max abs err = {max_err}"
    print("KERNEL_OK")
</pallas_src>

<mosaic_0001>
module attributes {stable_mosaic.version = 11 : i64} {
  func.func @_resblock_kernel(%arg0: i32, %arg1: memref<2x16x128xbf16, #tpu.memory_space<vmem>>, %arg2: memref<384x128xbf16, #tpu.memory_space<vmem>>, %arg3: memref<1x128xf32, #tpu.memory_space<vmem>>, %arg4: memref<384x128xbf16, #tpu.memory_space<vmem>>, %arg5: memref<1x128xf32, #tpu.memory_space<vmem>>, %arg6: memref<2x16x128xf32, #tpu.memory_space<vmem>>, %arg7: memref<2x16x384xf32, #tpu.memory_space<vmem>>) attributes {dimension_semantics = [#tpu.dimension_semantics<parallel>], iteration_bounds = array<i64: 1>, scalar_prefetch = 0 : i64, scratch_operands = 1 : i64, tpu.core_type = #tpu.core_type<tc>, window_params = [{transform_indices = @transform_0, window_bounds = array<i64: 2, 16, 128>}, {pipeline_mode = #tpu.pipeline_mode<synchronous>, transform_indices = @transform_1, window_bounds = array<i64: 384, 128>}, {pipeline_mode = #tpu.pipeline_mode<synchronous>, transform_indices = @transform_2, window_bounds = array<i64: 1, 128>}, {pipeline_mode = #tpu.pipeline_mode<synchronous>, transform_indices = @transform_3, window_bounds = array<i64: 384, 128>}, {pipeline_mode = #tpu.pipeline_mode<synchronous>, transform_indices = @transform_4, window_bounds = array<i64: 1, 128>}, {transform_indices = @transform_5, window_bounds = array<i64: 2, 16, 128>}]} {
    %cst = arith.constant 0.000000e+00 : f32
    %0 = vector.broadcast %cst : f32 to vector<2x1x128xf32>
    %c0 = arith.constant 0 : index
    %c0_0 = arith.constant 0 : index
    %c0_1 = arith.constant 0 : index
    %1 = vector.load %arg7[%c0, %c0_0, %c0_1] : memref<2x16x384xf32, #tpu.memory_space<vmem>>, vector<2x1x128xf32>
    tpu.vector_store %arg7[%c0, %c0_0, %c0_1], %0 {strides = array<i32>} : memref<2x16x384xf32, #tpu.memory_space<vmem>>, vector<2x1x128xf32>,
    %c0_2 = arith.constant 0 : index
    %c15 = arith.constant 15 : index
    %c256 = arith.constant 256 : index
    %2 = vector.load %arg7[%c0_2, %c15, %c256] : memref<2x16x384xf32, #tpu.memory_space<vmem>>, vector<2x1x128xf32>
    tpu.vector_store %arg7[%c0_2, %c15, %c256], %0 {strides = array<i32>} : memref<2x16x384xf32, #tpu.memory_space<vmem>>, vector<2x1x128xf32>,
    %c0_3 = arith.constant 0 : index
    %c0_4 = arith.constant 0 : index
    %c0_5 = arith.constant 0 : index
    %3 = vector.load %arg1[%c0_3, %c0_4, %c0_5] : memref<2x16x128xbf16, #tpu.memory_space<vmem>>, vector<2x16x128xbf16>
    %4 = arith.extf %3 : vector<2x16x128xbf16> to vector<2x16x128xf32>
    %5 = vector.extract_strided_slice %4 {offsets = [0, 0, 0], sizes = [2, 15, 128], strides = [1, 1, 1]} : vector<2x16x128xf32> to vector<2x15x128xf32>
    %c0_6 = arith.constant 0 : index
    %c1 = arith.constant 1 : index
    %c0_7 = arith.constant 0 : index
    %6 = vector.load %arg7[%c0_6, %c1, %c0_7] : memref<2x16x384xf32, #tpu.memory_space<vmem>>, vector<2x15x128xf32>
    tpu.vector_store %arg7[%c0_6, %c1, %c0_7], %5 {strides = array<i32>} : memref<2x16x384xf32, #tpu.memory_space<vmem>>, vector<2x15x128xf32>,
    %c0_8 = arith.constant 0 : index
    %c0_9 = arith.constant 0 : index
    %c128 = arith.constant 128 : index
    %7 = vector.load %arg7[%c0_8, %c0_9, %c128] : memref<2x16x384xf32, #tpu.memory_space<vmem>>, vector<2x16x128xf32>
    tpu.vector_store %arg7[%c0_8, %c0_9, %c128], %4 {strides = array<i32>} : memref<2x16x384xf32, #tpu.memory_space<vmem>>, vector<2x16x128xf32>,
    %8 = vector.extract_strided_slice %4 {offsets = [0, 1, 0], sizes = [2, 15, 128], strides = [1, 1, 1]} : vector<2x16x128xf32> to vector<2x15x128xf32>
    %c0_10 = arith.constant 0 : index
    %c0_11 = arith.constant 0 : index
    %c256_12 = arith.constant 256 : index
    %9 = vector.load %arg7[%c0_10, %c0_11, %c256_12] : memref<2x16x384xf32, #tpu.memory_space<vmem>>, vector<2x15x128xf32>
    tpu.vector_store %arg7[%c0_10, %c0_11, %c256_12], %8 {strides = array<i32>} : memref<2x16x384xf32, #tpu.memory_space<vmem>>, vector<2x15x128xf32>,
    %c0_13 = arith.constant 0 : index
    %c0_14 = arith.constant 0 : index
    %c0_15 = arith.constant 0 : index
    %10 = vector.load %arg7[%c0_13, %c0_14, %c0_15] : memref<2x16x384xf32, #tpu.memory_space<vmem>>, vector<2x16x384xf32>
    %11 = vector.shape_cast %10 : vector<2x16x384xf32> to vector<32x384xf32>
    %12 = arith.truncf %11 : vector<32x384xf32> to vector<32x384xbf16>
    %c0_16 = arith.constant 0 : index
    %c0_17 = arith.constant 0 : index
    %13 = vector.load %arg2[%c0_16, %c0_17] : memref<384x128xbf16, #tpu.memory_space<vmem>>, vector<384x128xbf16>
    %cst_18 = arith.constant dense<0.000000e+00> : vector<32x128xf32>
    %14 = tpu.matmul %12, %13, %cst_18 {dimension_numbers = #tpu.dot_dimension_numbers<[1], [0], [0], [1], [0, 0, 1, 1], [], []>} : vector<32x384xbf16>, vector<384x128xbf16>, vector<32x128xf32> -> vector<32x128xf32>
    %c0_19 = arith.constant 0 : index
    %c0_20 = arith.constant 0 : index
    %15 = vector.load %arg3[%c0_19, %c0_20] : memref<1x128xf32, #tpu.memory_space<vmem>>, vector<1x128xf32>
    %16 = vector.broadcast %15 : vector<1x128xf32> to vector<32x128xf32>
    %17 = arith.addf %14, %16 : vector<32x128xf32>
    %cst_21 = arith.constant 0.000000e+00 : f32
    %18 = vector.broadcast %cst_21 : f32 to vector<32x128xf32>
    %19 = arith.maximumf %17, %18 : vector<32x128xf32>
    %20 = vector.shape_cast %19 : vector<32x128xf32> to vector<2x16x128xf32>
    %21 = vector.extract_strided_slice %20 {offsets = [0, 0, 0], sizes = [2, 15, 128], strides = [1, 1, 1]} : vector<2x16x128xf32> to vector<2x15x128xf32>
    %c0_22 = arith.constant 0 : index
    %c1_23 = arith.constant 1 : index
    %c0_24 = arith.constant 0 : index
    %22 = vector.load %arg7[%c0_22, %c1_23, %c0_24] : memref<2x16x384xf32, #tpu.memory_space<vmem>>, vector<2x15x128xf32>
    tpu.vector_store %arg7[%c0_22, %c1_23, %c0_24], %21 {strides = array<i32>} : memref<2x16x384xf32, #tpu.memory_space<vmem>>, vector<2x15x128xf32>,
    %c0_25 = arith.constant 0 : index
    %c0_26 = arith.constant 0 : index
    %c128_27 = arith.constant 128 : index
    %23 = vector.load %arg7[%c0_25, %c0_26, %c128_27] : memref<2x16x384xf32, #tpu.memory_space<vmem>>, vector<2x16x128xf32>
    tpu.vector_store %arg7[%c0_25, %c0_26, %c128_27], %20 {strides = array<i32>} : memref<2x16x384xf32, #tpu.memory_space<vmem>>, vector<2x16x128xf32>,
    %24 = vector.extract_strided_slice %20 {offsets = [0, 1, 0], sizes = [2, 15, 128], strides = [1, 1, 1]} : vector<2x16x128xf32> to vector<2x15x128xf32>
    %c0_28 = arith.constant 0 : index
    %c0_29 = arith.constant 0 : index
    %c256_30 = arith.constant 256 : index
    %25 = vector.load %arg7[%c0_28, %c0_29, %c256_30] : memref<2x16x384xf32, #tpu.memory_space<vmem>>, vector<2x15x128xf32>
    tpu.vector_store %arg7[%c0_28, %c0_29, %c256_30], %24 {strides = array<i32>} : memref<2x16x384xf32, #tpu.memory_space<vmem>>, vector<2x15x128xf32>,
    %c0_31 = arith.constant 0 : index
    %c0_32 = arith.constant 0 : index
    %c0_33 = arith.constant 0 : index
    %26 = vector.load %arg7[%c0_31, %c0_32, %c0_33] : memref<2x16x384xf32, #tpu.memory_space<vmem>>, vector<2x16x384xf32>
    %27 = vector.shape_cast %26 : vector<2x16x384xf32> to vector<32x384xf32>
    %28 = arith.truncf %27 : vector<32x384xf32> to vector<32x384xbf16>
    %c0_34 = arith.constant 0 : index
    %c0_35 = arith.constant 0 : index
    %29 = vector.load %arg4[%c0_34, %c0_35] : memref<384x128xbf16, #tpu.memory_space<vmem>>, vector<384x128xbf16>
    %cst_36 = arith.constant dense<0.000000e+00> : vector<32x128xf32>
    %30 = tpu.matmul %28, %29, %cst_36 {dimension_numbers = #tpu.dot_dimension_numbers<[1], [0], [0], [1], [0, 0, 1, 1], [], []>} : vector<32x384xbf16>, vector<384x128xbf16>, vector<32x128xf32> -> vector<32x128xf32>
    %c0_37 = arith.constant 0 : index
    %c0_38 = arith.constant 0 : index
    %31 = vector.load %arg5[%c0_37, %c0_38] : memref<1x128xf32, #tpu.memory_space<vmem>>, vector<1x128xf32>
    %32 = vector.broadcast %31 : vector<1x128xf32> to vector<32x128xf32>
    %33 = arith.addf %30, %32 : vector<32x128xf32>
    %34 = vector.shape_cast %4 : vector<2x16x128xf32> to vector<32x128xf32>
    %35 = arith.addf %33, %34 : vector<32x128xf32>
    %cst_39 = arith.constant 0.000000e+00 : f32
    %36 = vector.broadcast %cst_39 : f32 to vector<32x128xf32>
    %37 = arith.maximumf %35, %36 : vector<32x128xf32>
    %38 = vector.shape_cast %37 : vector<32x128xf32> to vector<2x16x128xf32>
    %c0_40 = arith.constant 0 : index
    %c0_41 = arith.constant 0 : index
    %c0_42 = arith.constant 0 : index
    %39 = vector.load %arg6[%c0_40, %c0_41, %c0_42] : memref<2x16x128xf32, #tpu.memory_space<vmem>>, vector<2x16x128xf32>
    tpu.vector_store %arg6[%c0_40, %c0_41, %c0_42], %38 {strides = array<i32>} : memref<2x16x128xf32, #tpu.memory_space<vmem>>, vector<2x16x128xf32>,
    return
  }
  func.func @transform_0(%arg0: i32) -> (i32, i32, i32) {
    %c0_i32 = arith.constant 0 : i32
    %c0_i32_0 = arith.constant 0 : i32
    %c0_i32_1 = arith.constant 0 : i32
    return %arg0, %c0_i32, %c0_i32_0 : i32, i32, i32
  }
  func.func @transform_1(%arg0: i32) -> (i32, i32) {
    %c0_i32 = arith.constant 0 : i32
    %c0_i32_0 = arith.constant 0 : i32
    %c0_i32_1 = arith.constant 0 : i32
    return %c0_i32, %c0_i32_0 : i32, i32
  }
  func.func @transform_2(%arg0: i32) -> (i32, i32) {
    %c0_i32 = arith.constant 0 : i32
    %c0_i32_0 = arith.constant 0 : i32
    %c0_i32_1 = arith.constant 0 : i32
    return %c0_i32, %c0_i32_0 : i32, i32
  }
  func.func @transform_3(%arg0: i32) -> (i32, i32) {
    %c0_i32 = arith.constant 0 : i32
    %c0_i32_0 = arith.constant 0 : i32
    %c0_i32_1 = arith.constant 0 : i32
    return %c0_i32, %c0_i32_0 : i32, i32
  }
  func.func @transform_4(%arg0: i32) -> (i32, i32) {
    %c0_i32 = arith.constant 0 : i32
    %c0_i32_0 = arith.constant 0 : i32
    %c0_i32_1 = arith.constant 0 : i32
    return %c0_i32, %c0_i32_0 : i32, i32
  }
  func.func @transform_5(%arg0: i32) -> (i32, i32, i32) {
    %c0_i32 = arith.constant 0 : i32
    %c0_i32_0 = arith.constant 0 : i32
    %c0_i32_1 = arith.constant 0 : i32
    return %arg0, %c0_i32, %c0_i32_0 : i32, i32, i32
  }
}

</mosaic_0001>

<bundles_post_ra>
// kernel: tpu_custom_call.1
= control target key start
LH: loop header
LB: loop body
LE: loop exit
PB: predicated region body
PF: predicated region fallthrough
CT: control target
= control target key end

     0   :  { %10 = vsyncpa [#allocation4], 0  ;;  %s1278_s0 = inlined_call_operand.hbm [shape: bf16[2,16,128], index: 0, kind: input, shape index: {}]   ;;  %s1279_s1 = inlined_call_operand.hbm [shape: bf16[384,128], index: 1, kind: input, shape index: {}]   ;;  %s1280_s2 = inlined_call_operand.vmem [shape: f32[1,128], index: 2, kind: input, shape index: {}]   ;;  %s1281_s3 = inlined_call_operand.hbm [shape: bf16[384,128], index: 3, kind: input, shape index: {}]   ;;  %s1282_s4 = inlined_call_operand.vmem [shape: f32[1,128], index: 4, kind: input, shape index: {}]   ;;  %s1283_s5 = inlined_call_operand.hbm [shape: f32[2,16,128], index: 5, kind: output, shape index: {}]  }
   0x1   :  { %11 = vsyncpa [#allocation7], 0 }
   0x2   :  { %12 = vsyncpa [#allocation5], 0  ;;  %s1141_s18 = smov [#allocation6]   ;;  %s1142_s20 = smov [#allocation3]  }
   0x3   :  { %s30_s19 = sshll.u32 %s1141_s18, 4  ;;  %s18_s21 = sshll.u32 %s1142_s20, 4  ;;  %s31_s19 = int_to_ptr.vmem [resolvable:$true] %s30_s19  ;;  %s1180_s21 = int_to_ptr.vmem [resolvable:$true] %s18_s21 }
   0x4   :  { %s1047_s24 = scalar_lea.hbm %s1279_s1, 3072 }
   0x5   :  { %p1048_p0 = scmp.ne.s32.totalorder %s1279_s1, %s1047_s24  ;;  %p1051_p1 = scmp.lt.u32.totalorder %s1047_s24, %s1279_s1 }
   0x7   :  { %p1053_p2 = pnand %p1051_p1, %p1048_p0 }
   0x9   :  { %1056 = shalt.err (!%p1053_p2)
}
   0xa   :  { %s1057_s29 = scalar_lea.vmem %s31_s19, 3072  ;;  %p1062_p4 = scmp.lt.s32.totalorder %s31_s19, %s31_s19 }
   0xb   :  { %p1058_p3 = scmp.ne.s32.totalorder %s31_s19, %s1057_s29  ;;  %p1063_p5 = scmp.lt.s32.totalorder %s1057_s29, %s1057_s29 }
   0xd   :  { %p1064_p6 = por %p1063_p5, %p1062_p4 }
   0xf   :  { %p1065_p7 = pnand %p1064_p6, %p1058_p3 }
  0x11   :  { %1068 = shalt.err (!%p1065_p7)
}
  0x12   :  { %s1143_s30 = smov 64   ;;  %s1144_s6 = smov 4  }
  0x13   :  { %36 = dma.hbm_to_vmem [thread:$0]  %s1279_s1, 3072, %s31_s19, [#allocation7], %s1143_s30, %s1143_s30, %s1144_s6  }
  0x14   :  { %s1069_s11 = scalar_lea.hbm %s1278_s0, 256 }
  0x15   :  { %p1070_p8 = scmp.ne.s32.totalorder %s1278_s0, %s1069_s11  ;;  %p1073_p9 = scmp.lt.u32.totalorder %s1069_s11, %s1278_s0 }
  0x17   :  { %p1075_p10 = pnand %p1073_p9, %p1070_p8 }
  0x19   :  { %1078 = shalt.err (!%p1075_p10)
}
  0x1a   :  { %s1079_s16 = scalar_lea.vmem %s1180_s21, 256  ;;  %p1084_p12 = scmp.lt.s32.totalorder %s1180_s21, %s1180_s21 }
  0x1b   :  { %p1080_p11 = scmp.ne.s32.totalorder %s1180_s21, %s1079_s16  ;;  %p1085_p13 = scmp.lt.s32.totalorder %s1079_s16, %s1079_s16 }
  0x1d   :  { %p1086_p0 = por %p1085_p13, %p1084_p12 }
  0x1f   :  { %p1087_p1 = pnand %p1086_p0, %p1080_p11 }
  0x21   :  { %1090 = shalt.err (!%p1087_p1)
}
  0x22   :  { %24 = dma.hbm_to_vmem [thread:$0]  %s1278_s0, 256, %s1180_s21, [#allocation4], %s1143_s30, %s1143_s30, %s1144_s6  }
  0x23   :  { %s1145_s18 = smov [#allocation8]   ;;  %s1091_s23 = scalar_lea.hbm %s1281_s3, 3072 }
  0x24   :  { %s44_s19 = sshll.u32 %s1145_s18, 4  ;;  %p1092_p2 = scmp.ne.s32.totalorder %s1281_s3, %s1091_s23  ;;  %s45_s19 = int_to_ptr.vmem [resolvable:$true] %s44_s19 }
  0x25   :  { %p1095_p3 = scmp.lt.u32.totalorder %s1091_s23, %s1281_s3 }
  0x27   :  { %p1097_p4 = pnand %p1095_p3, %p1092_p2 }
  0x29   :  { %1100 = shalt.err (!%p1097_p4)
}
  0x2a   :  { %s1101_s28 = scalar_lea.vmem %s45_s19, 3072  ;;  %p1106_p6 = scmp.lt.s32.totalorder %s45_s19, %s45_s19 }
  0x2b   :  { %p1102_p5 = scmp.ne.s32.totalorder %s45_s19, %s1101_s28  ;;  %p1107_p7 = scmp.lt.s32.totalorder %s1101_s28, %s1101_s28 }
  0x2d   :  { %p1108_p8 = por %p1107_p7, %p1106_p6 }
  0x2f   :  { %p1109_p9 = pnand %p1108_p8, %p1102_p5 }
  0x31   :  { %1112 = shalt.err (!%p1109_p9)
}
  0x32   :  { %50 = dma.hbm_to_vmem [thread:$0]  %s1281_s3, 3072, %s45_s19, [#allocation7], %s1143_s30, %s1143_s30, %s1144_s6  }
  0x33   :  { %1135 = dma.done.wait [#allocation4], 256  }
  0x34   :  { %1136 = vsyncadd [#allocation4], 4294967040 }
  0x35   :  { %1137 = dma.done.wait [#allocation7], 6144  }
  0x36   :  { %1138 = vsyncadd [#allocation7], 4294961152  ;;  %v1146_v0 = vmov 0.0   ;;  %v997_v1 = vld [vmem:[#allocation6 + $0x40] sm:$0xff]   ;;  %v1000_v4 = vld [vmem:[#allocation6 + $0x48] sm:$0xff]   ;;  %vm79_vm0 = vcmask 1040384  }
  0x37   :  { %63 = vst [vmem:[#allocation2] sm:$0x1] %v1146_v0  ;;  %64 = vst [vmem:[#allocation2 + $0x30] sm:$0x1] %v1146_v0  ;;  %v998_v2 = vld [vmem:[#allocation6] sm:$0xff]   ;;  %872 = vmatprep.subr.bf16.mxu0 %v997_v1  ;;  %v1001_v5 = vld [vmem:[#allocation6 + $0x8] sm:$0xff]  }
  0x38   :  { %65 = vst [vmem:[#allocation2 + $0x2f] sm:$0x1] %v1146_v0  ;;  %66 = vst [vmem:[#allocation2 + $0x5f] sm:$0x1] %v1146_v0  ;;  %v999_v3 = vld [vmem:[#allocation6 + $0x80] sm:$0xff]   ;;  %873 = vmatpush3.bf16.msra.mxu0 %v998_v2  ;;  %v1002_v6 = vld [vmem:[#allocation6 + $0x88] sm:$0xff]  }
  0x39   :  { %948 = vmatprep.subr.bf16.mxu1 %v999_v3  ;;  %874 = vmatprep.subr.bf16.mxu0 %v1000_v4  ;;  %v1003_v7 = vld [vmem:[#allocation6 + $0x50] sm:$0xff]   ;;  %v1006_v10 = vld [vmem:[#allocation6 + $0x58] sm:$0xff]   ;;  %v1009_v13 = vld [vmem:[#allocation6 + $0x60] sm:$0xff]   ;;  %vm98_vm1 = vcmask 1046528  }
  0x3a   :  { %949 = vmatpush3.bf16.msra.mxu1 %v999_v3  ;;  %v1004_v8 = vld [vmem:[#allocation6 + $0x10] sm:$0xff]   ;;  %v1007_v11 = vld [vmem:[#allocation6 + $0x18] sm:$0xff]   ;;  %v1011_v14 = vld [vmem:[#allocation6 + $0xa0] sm:$0xff]  }
  0x3b   :  { %950 = vmatprep.subr.bf16.mxu1 %v1002_v6  ;;  %v1005_v9 = vld [vmem:[#allocation6 + $0x90] sm:$0xff]   ;;  %v1008_v12 = vld [vmem:[#allocation6 + $0x98] sm:$0xff]   ;;  %v1010_v15 = vld [vmem:[#allocation6 + $0x20] sm:$0xff]  }
  0x3c   :  { %875 = vmatpush3.bf16.msra.mxu0 %v1001_v5  ;;  %v1012_v16 = vld [vmem:[#allocation6 + $0x68] sm:$0xff]   ;;  %v1015_v19 = vld [vmem:[#allocation6 + $0x70] sm:$0xff]   ;;  %v1018_v22 = vld [vmem:[#allocation6 + $0x78] sm:$0xff]  }
  0x3d   :  { %876 = vmatprep.subr.bf16.mxu0 %v1003_v7  ;;  %v1014_v17 = vld [vmem:[#allocation6 + $0xa8] sm:$0xff]   ;;  %v1016_v20 = vld [vmem:[#allocation6 + $0x30] sm:$0xff]   ;;  %v871_v25 = vld [vmem:[#allocation3 + $0x8] sm:$0xff]  }
  0x3e   :  { %951 = vmatpush3.bf16.msra.mxu1 %v1002_v6  ;;  %v1013_v18 = vld [vmem:[#allocation6 + $0x28] sm:$0xff]   ;;  %v1017_v21 = vld [vmem:[#allocation6 + $0xb0] sm:$0xff]   ;;  %v1236_v28 = vunpack.c.l.bf16 %v871_v25  ;;  %v1238_v29 = vunpack.c.h.bf16 %v871_v25  ;;  %v1020_v30 = vld [vmem:[#allocation6 + $0xb8] sm:$0xff]  }
  0x3f   :  { %952 = vmatprep.subr.bf16.mxu1 %v1005_v9  ;;  %v864_v23 = vld [vmem:[#allocation3] sm:$0xff]   ;;  %v1019_v31 = vld [vmem:[#allocation6 + $0x38] sm:$0xff]   ;;  %v1023_v37 = vld [vmem:[#allocation8 + $0x40] sm:$0xff]  }
  0x40   :  { %877 = vmatpush3.bf16.msra.mxu0 %v1004_v8  ;;  %v1021_v24 = vld [vmem:[#allocation3] sm:$0xff]  ;;  %v1232_v26 = vunpack.c.l.bf16 %v864_v23  ;;  %v1234_v27 = vunpack.c.h.bf16 %v864_v23  ;;  %v103_v35 = vrot.slane %v1238_v29, 1  ;;  %v83_v36 = vrot.slane %v1236_v28, 7  ;;  %v1022_v42 = vld [vmem:[#allocation3 + $0x8] sm:$0xff]  ;;  %v1024_v44 = vld [vmem:[#allocation8] sm:$0xff]  }
  0x41   :  { %878 = vmatprep.subr.bf16.mxu0 %v1006_v10  ;;  %362 = vmatprep.mubr.bf16.mxu0 %v1021_v24  ;;  %v102_v39 = vrot.slane %v1236_v28, 1  ;;  %v84_v47 = vrot.slane %v1238_v29, 7  ;;  %v1025_v51 = vld [vmem:[#allocation8 + $0x48] sm:$0xff]   ;;  %v1027_v57 = vld [vmem:[#allocation8 + $0x50] sm:$0xff]   ;;  %v1028_v59 = vld [vmem:[#allocation8 + $0x80] sm:$0xff]  }
  0x42   :  { %953 = vmatpush3.bf16.msra.mxu1 %v1005_v9  ;;  %v80_v32 = vrot.slane %v1232_v26, 7  ;;  %v100_v33 = vrot.slane %v1234_v27, 1  ;;  %v81_v34 = vrot.slane %v1234_v27, 7  ;;  %v99_v38 = vrot.slane %v1232_v26, 1  ;;  %112 = vst [vmem:[#allocation2 + $0x58] sm:$0x7f] %v103_v35 }
  0x43   :  { %954 = vmatprep.subr.bf16.mxu1 %v1008_v12  ;;  %92 = vst [vmem:[#allocation2 + $0x30] sm:$0xfe] %v83_v36  ;;  %v104_v43 = vsel %vm98_vm1, %v102_v39, %v103_v35  ;;  %v1026_v54 = vld [vmem:[#allocation8 + $0x8] sm:$0xff]   ;;  %v85_v55 = vsel %vm79_vm0, %v83_v36, %v84_v47  ;;  %v1029_v58 = vld [vmem:[#allocation8 + $0x10] sm:$0xff]   ;;  %v1030_v60 = vld [vmem:[#allocation8 + $0x58] sm:$0xff]  }
  0x44   :  { %879 = vmatpush3.bf16.msra.mxu0 %v1007_v11  ;;  %90 = vst [vmem:[#allocation2] sm:$0xfe] %v80_v32  ;;  %110 = vst [vmem:[#allocation2 + $0x28] sm:$0x7f] %v100_v33  ;;  %v82_v40 = vsel %vm79_vm0, %v80_v32, %v81_v34  ;;  %v101_v41 = vsel %vm98_vm1, %v99_v38, %v100_v33  ;;  %v1032_v61 = vld [vmem:[#allocation8 + $0x18] sm:$0xff]   ;;  %v1031_v62 = vld [vmem:[#allocation8 + $0x88] sm:$0xff]  }
  0x45   :  { %880 = vmatprep.subr.bf16.mxu0 %v1009_v13  ;;  %v1033_v63 = vld [vmem:[#allocation8 + $0x60] sm:$0xff]   ;;  %v1034_v1 = vld [vmem:[#allocation8 + $0x90] sm:$0xff]   ;;  %v1036_v2 = vld [vmem:[#allocation8 + $0x68] sm:$0xff]  }
  0x46   :  { %955 = vmatpush3.bf16.msra.mxu1 %v1008_v12  ;;  %v1035_v0 = vld [vmem:[#allocation8 + $0x20] sm:$0xff]   ;;  %v1038_v3 = vld [vmem:[#allocation8 + $0x28] sm:$0xff]   ;;  %v1037_v4 = vld [vmem:[#allocation8 + $0x98] sm:$0xff]  }
  0x47   :  { %956 = vmatprep.subr.bf16.mxu1 %v1011_v14  ;;  %v1039_v5 = vld [vmem:[#allocation8 + $0x70] sm:$0xff]   ;;  %v1040_v7 = vld [vmem:[#allocation8 + $0xa0] sm:$0xff]   ;;  %v1042_v8 = vld [vmem:[#allocation8 + $0x78] sm:$0xff]  }
  0x48   :  { %881 = vmatpush3.bf16.msra.mxu0 %v1010_v15  ;;  %v1041_v6 = vld [vmem:[#allocation8 + $0x30] sm:$0xff]   ;;  %v1044_v9 = vld [vmem:[#allocation8 + $0x38] sm:$0xff]   ;;  %v1043_v10 = vld [vmem:[#allocation8 + $0xa8] sm:$0xff]  }
  0x49   :  { %882 = vmatprep.subr.bf16.mxu0 %v1012_v16  ;;  %v124_v50 = vld [vmem:[#allocation2 + $0x58] sm:$0xff]  ;;  %v1045_v11 = vld [vmem:[#allocation8 + $0xb0] sm:$0xff]   ;;  %v1046_v12 = vld [vmem:[#allocation8 + $0xb8] sm:$0xff]  }
  0x4a   :  { %957 = vmatpush3.bf16.msra.mxu1 %v1011_v14  ;;  %v130_v52 = vpack.c.bf16 %v124_v50, %v104_v43  ;;  %v119_v53 = vld [vmem:[#allocation2 + $0x30] sm:$0xff]  ;;  %v813_v16 = vld [vmem:[%s1280_s2] ss:$0 sm:$0xff] }
  0x4b   :  { %958 = vmatprep.subr.bf16.mxu1 %v1014_v17  ;;  %v113_v45 = vld [vmem:[#allocation2] sm:$0xff]  ;;  %v118_v46 = vld [vmem:[#allocation2 + $0x28] sm:$0xff]  ;;  %v128_v56 = vpack.c.bf16 %v85_v55, %v119_v53 }
  0x4c   :  { %883 = vmatpush3.bf16.msra.mxu0 %v1013_v18  ;;  %v125_v48 = vpack.c.bf16 %v82_v40, %v113_v45  ;;  %v127_v49 = vpack.c.bf16 %v118_v46, %v101_v41 }
  0x4d   :  { %884 = vmatprep.subr.bf16.mxu0 %v1015_v19 }
  0x4e   :  { %959 = vmatpush3.bf16.msra.mxu1 %v1014_v17  ;;  %964 = vmatprep.mubr.bf16.mxu1 %v127_v49 }
  0x4f   :  { %960 = vmatprep.subr.bf16.mxu1 %v1017_v21 }
  0x50   :  { %885 = vmatpush3.bf16.msra.mxu0 %v1016_v20 }
  0x51   :  { %886 = vmatprep.subr.bf16.mxu0 %v1018_v22 }
  0x52   :  { %961 = vmatpush3.bf16.msra.mxu1 %v1017_v21 }
  0x53   :  { %962 = vmatprep.subr.bf16.mxu1 %v1020_v30 }
  0x54   :  { %887 = vmatpush3.bf16.msra.mxu0 %v1019_v31 }
  0x55   :  { %910 = vmatprep.subr.bf16.mxu0 %v1023_v37 }
  0x56   :  { %963 = vmatpush3.bf16.msra.mxu1 %v1020_v30 }
  0x57   :  { %363 = vmatmul.mubr.bf16.vlgmr.msra.gmra.mrb[0].mxu0 %v125_v48  ;;  %968 = vmatprep.subr.bf16.mxu1 %v1028_v59 }
  0x58   :  { %370 = vmatprep.mubr.bf16.mxu0 %v1022_v42  ;;  %911 = vmatpush3.bf16.msra.mxu0 %v1024_v44 }
  0x59   :  { %965 = vmatmul.mubr.bf16.vlgmr.msra.gmra.mrb[0].mxu1 %v130_v52  ;;  %912 = vmatprep.subr.bf16.mxu0 %v1025_v51 }
  0x5a   :  { %969 = vmatpush3.bf16.msra.mxu1 %v1028_v59 }
  0x5b   :  { %970 = vmatprep.subr.bf16.mxu1 %v1031_v62 }
  0x5c   :  { %913 = vmatpush3.bf16.msra.mxu0 %v1026_v54 }
  0x5d   :  { %914 = vmatprep.subr.bf16.mxu0 %v1027_v57 }
  0x5e   :  { %971 = vmatpush3.bf16.msra.mxu1 %v1031_v62 }
  0x5f   :  { %371 = vmatmul.mubr.bf16.gmra.mrb[4].mxu0 %v128_v56  ;;  %972 = vmatprep.subr.bf16.mxu1 %v1034_v1 }
  0x60   :  { %915 = vmatpush3.bf16.msra.mxu0 %v1029_v58 }
  0x61   :  { %916 = vmatprep.subr.bf16.mxu0 %v1030_v60 }
  0x62   :  { %973 = vmatpush3.bf16.msra.mxu1 %v1034_v1 }
  0x63   :  { %974 = vmatprep.subr.bf16.mxu1 %v1037_v4 }
  0x64   :  { %917 = vmatpush3.bf16.msra.mxu0 %v1032_v61 }
  0x65   :  { %918 = vmatprep.subr.bf16.mxu0 %v1033_v63 }
  0x66   :  { %975 = vmatpush3.bf16.msra.mxu1 %v1037_v4 }
  0x67   :  { %976 = vmatprep.subr.bf16.mxu1 %v1040_v7 }
  0x68   :  { %919 = vmatpush3.bf16.msra.mxu0 %v1035_v0 }
  0x69   :  { %920 = vmatprep.subr.bf16.mxu0 %v1036_v2 }
  0x6a   :  { %977 = vmatpush3.bf16.msra.mxu1 %v1040_v7 }
  0x6b   :  { %978 = vmatprep.subr.bf16.mxu1 %v1043_v10 }
  0x6c   :  { %921 = vmatpush3.bf16.msra.mxu0 %v1038_v3 }
  0x6d   :  { %922 = vmatprep.subr.bf16.mxu0 %v1039_v5 }
  0x6e   :  { %979 = vmatpush3.bf16.msra.mxu1 %v1043_v10  ;;  %v838_v10 = vld [vmem:[%s1282_s4] ss:$0 sm:$0xff]  ;;  %s1147_s4 = smov [#allocation9]  }
  0x6f   :  { %980 = vmatprep.subr.bf16.mxu1 %v1045_v11  ;;  %s800_s6 = sshll.u32 %s1147_s4, 4  ;;  %s801_s6 = int_to_ptr.vmem [resolvable:$true] %s800_s6 }
  0x70   :  { %923 = vmatpush3.bf16.msra.mxu0 %v1041_v6  ;;  %s1113_s7 = scalar_lea.vmem %s801_s6, 512  ;;  %p1118_p11 = scmp.lt.s32.totalorder %s801_s6, %s801_s6 }
  0x71   :  { %924 = vmatprep.subr.bf16.mxu0 %v1042_v8  ;;  %p1114_p10 = scmp.ne.s32.totalorder %s801_s6, %s1113_s7  ;;  %p1119_p12 = scmp.lt.s32.totalorder %s1113_s7, %s1113_s7 }
  0x72   :  { %981 = vmatpush3.bf16.msra.mxu1 %v1045_v11 }
  0x73   :  { %982 = vmatprep.subr.bf16.mxu1 %v1046_v12  ;;  %p1120_p13 = por %p1119_p12, %p1118_p11 }
  0x74   :  { %925 = vmatpush3.bf16.msra.mxu0 %v1044_v9 }
  0x75   :  { %p1121_p0 = pnand %p1120_p13, %p1114_p10 }
  0x76   :  { %983 = vmatpush3.bf16.msra.mxu1 %v1046_v12 }
 0x12a   :  { %v888_v13 = vpop.f32.mrb[0].mxu0 }
 0x12b   :  { %v889_v14 = vpop.f32.mrb[1].mxu0 }
 0x12c   :  { %v966_v15 = vpop.f32.mrb[0].mxu1  ;;  %v890_v17 = vadd.f32 %v889_v14, %v888_v13  ;;  %v891_v18 = vpop.f32.mrb[2].mxu0 }
 0x12d   :  { %v413_v19 = vpop.f32.mrb[1].mxu1  ;;  %v892_v20 = vpop.f32.mrb[3].mxu0 }
 0x12e   :  { %v967_v21 = vpop.f32.mrb[2].mxu1  ;;  %v365_v22 = vadd.f32 %v890_v17, %v813_v16  ;;  %v893_v23 = vadd.f32 %v892_v20, %v891_v18 }
 0x12f   :  { %v416_v24 = vpop.f32.mrb[3].mxu1 }
 0x130   :  { %v414_v25 = vadd.f32 %v413_v19, %v365_v22  ;;  %v368_v30 = vadd.f32 %v893_v23, %v813_v16 }
 0x132   :  { %v428_v31 = vmax.f32 %v414_v25, 0.0  ;;  %v417_v32 = vadd.f32 %v416_v24, %v368_v30  ;;  %v894_v33 = vpop.f32.mrb[4].mxu0 }
 0x133   :  { %v895_v34 = vpop.f32.mrb[5].mxu0 }
 0x134   :  { %v436_v35 = vrot.slane %v428_v31, 7  ;;  %v429_v36 = vmax.f32 %v417_v32, 0.0  ;;  %v896_v37 = vadd.f32 %v895_v34, %v894_v33  ;;  %v897_v38 = vpop.f32.mrb[6].mxu0  ;;  %v454_v39 = vrot.slane %v428_v31, 1 }
 0x135   :  { %v898_v40 = vpop.f32.mrb[7].mxu0 }
 0x136   :  { %446 = vst [vmem:[#allocation2] sm:$0xfe] %v436_v35  ;;  %v437_v41 = vrot.slane %v429_v36, 7  ;;  %v455_v42 = vrot.slane %v429_v36, 1  ;;  %v373_v43 = vadd.f32 %v896_v37, %v813_v16  ;;  %v899_v44 = vadd.f32 %v898_v40, %v897_v38 }
 0x137   :  { %v481_v45 = vpack.c.bf16 %v429_v36, %v428_v31 }
 0x138   :  { %v438_v46 = vsel %vm79_vm0, %v436_v35, %v437_v41  ;;  %v456_v47 = vsel %vm98_vm1, %v454_v39, %v455_v42  ;;  %465 = vst [vmem:[#allocation2 + $0x28] sm:$0x7f] %v455_v42  ;;  %v422_v48 = vadd.f32 %v966_v15, %v373_v43  ;;  %v376_v49 = vadd.f32 %v899_v44, %v813_v16 }
 0x139   :  { %717 = vmatprep.mubr.bf16.mxu0 %v481_v45 }
 0x13a   :  { %v430_v50 = vmax.f32 %v422_v48, 0.0  ;;  %v425_v51 = vadd.f32 %v967_v21, %v376_v49 }
 0x13c   :  { %v439_v52 = vrot.slane %v430_v50, 7  ;;  %v431_v53 = vmax.f32 %v425_v51, 0.0  ;;  %v457_v54 = vrot.slane %v430_v50, 1 }
 0x13d   :  { %v468_v55 = vld [vmem:[#allocation2] sm:$0xff] }
 0x13e   :  { %448 = vst [vmem:[#allocation2 + $0x30] sm:$0xfe] %v439_v52  ;;  %v440_v56 = vrot.slane %v431_v53, 7  ;;  %v458_v57 = vrot.slane %v431_v53, 1  ;;  %v480_v58 = vpack.c.bf16 %v438_v46, %v468_v55  ;;  %v484_v59 = vpack.c.bf16 %v431_v53, %v430_v50 }
 0x13f   :  { %v473_v60 = vld [vmem:[#allocation2 + $0x28] sm:$0xff] }
 0x140   :  { %v441_v61 = vsel %vm79_vm0, %v439_v52, %v440_v56  ;;  %v459_v62 = vsel %vm98_vm1, %v457_v54, %v458_v57  ;;  %467 = vst [vmem:[#allocation2 + $0x58] sm:$0x7f] %v458_v57  ;;  %718 = vmatmul.mubr.bf16.vlgmr.msra.gmra.mrb[8].mxu0 %v480_v58  ;;  %v482_v63 = vpack.c.bf16 %v473_v60, %v456_v47 }
 0x141   :  { %725 = vmatprep.mubr.bf16.mxu0 %v484_v59 }
 0x142   :  { %984 = vmatprep.mubr.bf16.mxu1 %v482_v63 }
 0x145   :  { %v474_v0 = vld [vmem:[#allocation2 + $0x30] sm:$0xff] }
 0x146   :  { %v483_v1 = vpack.c.bf16 %v441_v61, %v474_v0 }
 0x147   :  { %v479_v2 = vld [vmem:[#allocation2 + $0x58] sm:$0xff] }
 0x148   :  { %726 = vmatmul.mubr.bf16.gmra.mrb[12].mxu0 %v483_v1  ;;  %v485_v3 = vpack.c.bf16 %v479_v2, %v459_v62 }
 0x14a   :  { %985 = vmatmul.mubr.bf16.vlgmr.msra.gmra.mrb[4].mxu1 %v485_v3 }
 0x213   :  { %v926_v4 = vpop.f32.mrb[8].mxu0 }
 0x214   :  { %v927_v5 = vpop.f32.mrb[9].mxu0 }
 0x215   :  { %v928_v6 = vadd.f32 %v927_v5, %v926_v4  ;;  %v929_v7 = vpop.f32.mrb[10].mxu0 }
 0x216   :  { %v930_v8 = vpop.f32.mrb[11].mxu0 }
 0x217   :  { %v931_v9 = vadd.f32 %v930_v8, %v929_v7  ;;  %v720_v15 = vadd.f32 %v928_v6, %v838_v10 }
 0x219   :  { %v723_v23 = vadd.f32 %v931_v9, %v838_v10 }
 0x21b   :  { %v932_v11 = vpop.f32.mrb[12].mxu0 }
 0x21c   :  { %v933_v12 = vpop.f32.mrb[13].mxu0 }
 0x21d   :  { %v986_v13 = vpop.f32.mrb[4].mxu1  ;;  %v934_v14 = vadd.f32 %v933_v12, %v932_v11  ;;  %v935_v16 = vpop.f32.mrb[14].mxu0 }
 0x21e   :  { %v768_v17 = vpop.f32.mrb[5].mxu1  ;;  %v936_v18 = vpop.f32.mrb[15].mxu0 }
 0x21f   :  { %v728_v19 = vadd.f32 %v934_v14, %v838_v10  ;;  %v769_v20 = vadd.f32 %v768_v17, %v720_v15  ;;  %v987_v21 = vpop.f32.mrb[6].mxu1  ;;  %v937_v22 = vadd.f32 %v936_v18, %v935_v16 }
 0x220   :  { %v771_v24 = vpop.f32.mrb[7].mxu1 }
 0x221   :  { %v777_v25 = vadd.f32 %v986_v13, %v728_v19  ;;  %v783_v30 = vadd.f32 %v1232_v26, %v769_v20  ;;  %v731_v31 = vadd.f32 %v937_v22, %v838_v10  ;;  %v772_v32 = vadd.f32 %v771_v24, %v723_v23 }
 0x223   :  { %v785_v33 = vadd.f32 %v1236_v28, %v777_v25  ;;  %v787_v34 = vmax.f32 %v783_v30, 0.0  ;;  %v780_v35 = vadd.f32 %v987_v21, %v731_v31  ;;  %v784_v36 = vadd.f32 %v1234_v27, %v772_v32 }
 0x225   :  { %v789_v37 = vmax.f32 %v785_v33, 0.0  ;;  %791 = vst [vmem:[#allocation9] sm:$0xff] %v787_v34  ;;  %v786_v38 = vadd.f32 %v1238_v29, %v780_v35  ;;  %v788_v39 = vmax.f32 %v784_v36, 0.0 }
 0x227   :  { %793 = vst [vmem:[#allocation9 + $0x10] sm:$0xff] %v789_v37  ;;  %v790_v40 = vmax.f32 %v786_v38, 0.0  ;;  %792 = vst [vmem:[#allocation9 + $0x8] sm:$0xff] %v788_v39 }
 0x229   :  { %794 = vst [vmem:[#allocation9 + $0x18] sm:$0xff] %v790_v40 }
 0x22a   :  { %1124 = shalt.err (!%p1121_p0)
}
 0x22b   :  { %s1125_s10 = scalar_lea.hbm %s1283_s5, 512 }
 0x22c   :  { %p1126_p1 = scmp.ne.s32.totalorder %s1283_s5, %s1125_s10  ;;  %p1129_p2 = scmp.lt.u32.totalorder %s1125_s10, %s1283_s5 }
 0x22e   :  { %p1131_p3 = pnand %p1129_p2, %p1126_p1 }
 0x230   :  { %1134 = shalt.err (!%p1131_p3)
}
 0x231   :  { %s1148_s15 = smov 128   ;;  %s1149_s16 = smov 8  }
 0x232   :  { %806 = dma.vmem_to_hbm [thread:$0]  %s801_s6, 512, %s1283_s5, [#allocation5], %s1148_s15, %s1148_s15, %s1149_s16  }
 0x233   :  { %1139 = dma.done.wait [#allocation5], 512  }
 0x234   :  { %1140 = vsyncadd [#allocation5], 4294966784 }
 0x235   :  { %810 = vsyncpa [#allocation4], 1 }
 0x236   :  { %811 = vsyncpa [#allocation7], 1 }
 0x237   :  { %812 = vsyncpa [#allocation5], 1 }

</bundles_post_ra>
